<compile_context>
chip_gen: v7x
topology: tpu7x:2x2x1
jax: 0.10.0
libtpu: 0.0.40
codegen_flags: <defaults>
</compile_context>

<pallas_src>
import functools

import numpy as np
import jax
import jax.numpy as jnp
from jax import lax
from jax.experimental import pallas as pl
from jax.experimental.pallas import tpu as pltpu

BN_EPS = 1e-5
ROW_TILE = 256  # rows of the flattened (N*H*W, C) matmul per grid step


def _round_up(x, m):
    return (x + m - 1) // m * m


# ----------------------------------------------------------------------------
# Pallas kernels
# ----------------------------------------------------------------------------
def _conv1x1_bn_kernel(x_ref, w_ref, b_ref, o_ref, *, relu):
    # x: (TP, Cin), w: (Cin, Cout) [BN-folded], b: (1, Cout) [BN-folded]
    y = jnp.dot(x_ref[...], w_ref[...], preferred_element_type=jnp.float32)
    y = y + b_ref[...]
    if relu:
        y = jnp.maximum(y, 0.0)
    o_ref[...] = y.astype(o_ref.dtype)


def _conv1x1_bn_res_kernel(x_ref, w_ref, b_ref, r_ref, o_ref, *, relu):
    # Same as above plus residual add after the activation (Bottleneck).
    y = jnp.dot(x_ref[...], w_ref[...], preferred_element_type=jnp.float32)
    y = y + b_ref[...]
    if relu:
        y = jnp.maximum(y, 0.0)
    o_ref[...] = (y + r_ref[...]).astype(o_ref.dtype)


def _conv3x3_bn_kernel(x0_ref, x1_ref, x2_ref, w_ref, b_ref, o_ref, acc_ref, *,
                       dilation, relu, width):
    # x{ky}: (1, 1, W+2d, Cin)  -- padded input row at H offset h + ky*d
    # w:     (9, Cin, Cout)     -- BN-folded taps (row-major ky*3+kx), resident
    # b:     (1, Cout)          -- BN-folded bias, resident
    # o:     (1, 1, W, Cout)
    # acc:   (W, Cout) f32 VMEM scratch accumulator
    d = dilation
    W = width
    acc_ref[...] = jnp.broadcast_to(b_ref[...], acc_ref.shape)
    x_rows = (x0_ref, x1_ref, x2_ref)
    for ky in range(3):
        for kx in range(3):
            xs = x_rows[ky][0, 0, kx * d:kx * d + W, :]        # (W, Cin)
            acc_ref[...] += jnp.dot(xs, w_ref[ky * 3 + kx],
                                    preferred_element_type=jnp.float32)
    y = acc_ref[...]
    if relu:
        y = jnp.maximum(y, 0.0)
    o_ref[...] = y.reshape(o_ref.shape).astype(o_ref.dtype)


# ----------------------------------------------------------------------------
# Wrappers (BN folding, tiling, pallas_call plumbing)
# ----------------------------------------------------------------------------
def _bn_scale_shift(bn, cout):
    gamma, beta, mean, var = bn
    scale = gamma / jnp.sqrt(var + BN_EPS)
    shift = beta - mean * scale
    return scale.reshape(1, cout), shift.reshape(1, cout)


def conv1x1_bn(x, w, b, bn, *, relu=False, residual=None):
    # x: (N, H, W, Cin) NHWC, w: (Cin, Cout)
    N, H, W_, Cin = x.shape
    Cout = w.shape[1]
    P = N * H * W_

    scale, shift = _bn_scale_shift(bn, Cout)
    wf = (w * scale).astype(x.dtype)                       # fold BN into weights
    bf = (b.reshape(1, Cout) * scale + shift).astype(jnp.float32)

    TP = min(ROW_TILE, _round_up(P, 8))
    Ppad = _round_up(P, TP)

    xf = x.reshape(P, Cin)
    if Ppad != P:
        xf = jnp.pad(xf, ((0, Ppad - P), (0, 0)))

    args = [xf, wf, bf]
    in_specs = [
        pl.BlockSpec((TP, Cin), lambda i: (i, 0)),
        pl.BlockSpec((Cin, Cout), lambda i: (0, 0)),
        pl.BlockSpec((1, Cout), lambda i: (0, 0)),
    ]
    if residual is None:
        kernel = functools.partial(_conv1x1_bn_kernel, relu=relu)
    else:
        rf = residual.reshape(P, Cout)
        if Ppad != P:
            rf = jnp.pad(rf, ((0, Ppad - P), (0, 0)))
        args.append(rf)
        in_specs.append(pl.BlockSpec((TP, Cout), lambda i: (i, 0)))
        kernel = functools.partial(_conv1x1_bn_res_kernel, relu=relu)

    out = pl.pallas_call(
        kernel,
        out_shape=jax.ShapeDtypeStruct((Ppad, Cout), x.dtype),
        grid=(Ppad // TP,),
        in_specs=in_specs,
        out_specs=pl.BlockSpec((TP, Cout), lambda i: (i, 0)),
        compiler_params=pltpu.CompilerParams(
            dimension_semantics=("parallel",)),
    )(*args)
    if Ppad != P:
        out = out[:P]
    return out.reshape(N, H, W_, Cout)


def conv3x3_bn(x, w9, b, bn, *, dilation=1, relu=False):
    # x: (N, H, W, Cin) NHWC, w9: (9, Cin, Cout) (taps row-major ky*3+kx)
    N, H, W_, Cin = x.shape
    Cout = w9.shape[-1]
    d = dilation

    scale, shift = _bn_scale_shift(bn, Cout)
    w9f = (w9 * scale.reshape(1, 1, Cout)).astype(x.dtype)  # fold BN into taps
    bf = (b.reshape(1, Cout) * scale + shift).astype(jnp.float32)

    xp = jnp.pad(x, ((0, 0), (d, d), (d, d), (0, 0)))       # halo pad (H, W)
    Wp = W_ + 2 * d

    def x_map(ky):
        return lambda n, h, _ky=ky: (n, h + _ky * d, 0, 0)

    kernel = functools.partial(_conv3x3_bn_kernel, dilation=d, relu=relu,
                               width=W_)
    out = pl.pallas_call(
        kernel,
        out_shape=jax.ShapeDtypeStruct((N, H, W_, Cout), x.dtype),
        grid=(N, H),
        in_specs=[
            pl.BlockSpec((1, 1, Wp, Cin), x_map(0)),
            pl.BlockSpec((1, 1, Wp, Cin), x_map(1)),
            pl.BlockSpec((1, 1, Wp, Cin), x_map(2)),
            pl.BlockSpec((9, Cin, Cout), lambda n, h: (0, 0, 0)),
            pl.BlockSpec((1, Cout), lambda n, h: (0, 0)),
        ],
        out_specs=pl.BlockSpec((1, 1, W_, Cout), lambda n, h: (n, h, 0, 0)),
        scratch_shapes=[pltpu.VMEM((W_, Cout), jnp.float32)],
        compiler_params=pltpu.CompilerParams(
            dimension_semantics=("parallel", "parallel")),
    )(xp, xp, xp, w9f, bf)
    return out


def dilated_encoder_forward(params, feature_nchw):
    """DilatedEncoder.forward. Input/output are NCHW like the PyTorch module."""
    x = jnp.transpose(feature_nchw, (0, 2, 3, 1))  # NCHW -> NHWC
    p = params
    out = conv1x1_bn(x, p['lateral_w'], p['lateral_b'], p['lateral_bn'],
                     relu=False)
    out = conv3x3_bn(out, p['fpn_w'], p['fpn_b'], p['fpn_bn'],
                     dilation=1, relu=False)
    for blk in p['blocks']:
        identity = out
        h = conv1x1_bn(out, blk['w1'], blk['b1'], blk['bn1'], relu=True)
        h = conv3x3_bn(h, blk['w2'], blk['b2'], blk['bn2'],
                       dilation=blk['dilation'], relu=True)
        out = conv1x1_bn(h, blk['w3'], blk['b3'], blk['bn3'], relu=True,
                         residual=identity)
    return jnp.transpose(out, (0, 3, 1, 2))  # NHWC -> NCHW


# ----------------------------------------------------------------------------
# Deterministic parameter init (mirrors DilatedEncoder._init_weight)
# ----------------------------------------------------------------------------
def init_params(key, in_channels, enc_c, mid_c, dilations):
    n_blocks = len(dilations)
    keys = jax.random.split(key, 2 + n_blocks)

    def xavier_1x1(k, cin, cout):     # c2_xavier_fill (kaiming_uniform a=1)
        bound = float(np.sqrt(3.0 / cin))
        return jax.random.uniform(k, (cin, cout), jnp.float32, -bound, bound)

    def xavier_3x3(k, cin, cout):
        bound = float(np.sqrt(3.0 / (cin * 9)))
        return jax.random.uniform(k, (9, cin, cout), jnp.float32, -bound, bound)

    def normal_1x1(k, cin, cout):     # nn.init.normal_(std=0.01)
        return 0.01 * jax.random.normal(k, (cin, cout), jnp.float32)

    def normal_3x3(k, cin, cout):
        return 0.01 * jax.random.normal(k, (9, cin, cout), jnp.float32)

    def bn(c):  # (gamma, beta, running_mean, running_var)
        return (jnp.ones((c,), jnp.float32), jnp.zeros((c,), jnp.float32),
                jnp.zeros((c,), jnp.float32), jnp.ones((c,), jnp.float32))

    params = {
        'lateral_w': xavier_1x1(keys[0], in_channels, enc_c),
        'lateral_b': jnp.zeros((enc_c,), jnp.float32),
        'lateral_bn': bn(enc_c),
        'fpn_w': xavier_3x3(keys[1], enc_c, enc_c),
        'fpn_b': jnp.zeros((enc_c,), jnp.float32),
        'fpn_bn': bn(enc_c),
        'blocks': [],
    }
    for i, d in enumerate(dilations):
        k1, k2, k3 = jax.random.split(keys[2 + i], 3)
        params['blocks'].append({
            'dilation': d,
            'w1': normal_1x1(k1, enc_c, mid_c),
            'b1': jnp.zeros((mid_c,), jnp.float32), 'bn1': bn(mid_c),
            'w2': normal_3x3(k2, mid_c, mid_c),
            'b2': jnp.zeros((mid_c,), jnp.float32), 'bn2': bn(mid_c),
            'w3': normal_1x1(k3, mid_c, enc_c),
            'b3': jnp.zeros((enc_c,), jnp.float32), 'bn3': bn(enc_c),
        })
    return params


# ----------------------------------------------------------------------------
# Pure-JAX reference (lax.conv, default precision) for correctness checking
# ----------------------------------------------------------------------------
def reference_forward(params, feature_nchw):
    x = jnp.transpose(feature_nchw, (0, 2, 3, 1))
    dn = ('NHWC', 'HWIO', 'NHWC')

    def bn_apply(y, bnp):
        gamma, beta, mean, var = bnp
        return (y - mean) / jnp.sqrt(var + BN_EPS) * gamma + beta

    def c1(y, w, b, bnp, relu):
        w4 = w.reshape(1, 1, *w.shape)
        y = lax.conv_general_dilated(y, w4, (1, 1), 'VALID',
                                     dimension_numbers=dn) + b
        y = bn_apply(y, bnp)
        return jnp.maximum(y, 0.0) if relu else y

    def c3(y, w9, b, bnp, d, relu):
        w4 = w9.reshape(3, 3, w9.shape[1], w9.shape[2])
        y = lax.conv_general_dilated(y, w4, (1, 1), [(d, d), (d, d)],
                                     rhs_dilation=(d, d),
                                     dimension_numbers=dn) + b
        y = bn_apply(y, bnp)
        return jnp.maximum(y, 0.0) if relu else y

    p = params
    out = c1(x, p['lateral_w'], p['lateral_b'], p['lateral_bn'], False)
    out = c3(out, p['fpn_w'], p['fpn_b'], p['fpn_bn'], 1, False)
    for blk in p['blocks']:
        identity = out
        h = c1(out, blk['w1'], blk['b1'], blk['bn1'], True)
        h = c3(h, blk['w2'], blk['b2'], blk['bn2'], blk['dilation'], True)
        h = c1(h, blk['w3'], blk['b3'], blk['bn3'], True)
        out = h + identity
    return jnp.transpose(out, (0, 3, 1, 2))


# ----------------------------------------------------------------------------
if __name__ == "__main__":
    key = jax.random.PRNGKey(0)
    kp, kx = jax.random.split(key)

    # Small synthetic config: in_channels=8, encoder_channels=16,
    # block_mid_channels=8, 2 residual blocks with dilations [1, 2].
    N, C_IN, H, W = 2, 8, 16, 16
    ENC_C, MID_C = 16, 8
    DILATIONS = [1, 2]

    params = init_params(kp, C_IN, ENC_C, MID_C, DILATIONS)
    feature = jax.random.normal(kx, (N, C_IN, H, W), jnp.float32)  # NCHW

    out = dilated_encoder_forward(params, feature)
    out = jax.block_until_ready(out)

    ref = reference_forward(params, feature)
    # Both paths use default (bf16-on-MXU) matmul precision with f32
    # accumulation, so tolerances are modest rather than tight-f32.
    np.testing.assert_allclose(np.asarray(out), np.asarray(ref),
                               rtol=2e-2, atol=2e-2)
    assert out.shape == (N, ENC_C, H, W)
    print("KERNEL_OK")
</pallas_src>

<mosaic_0001>
module attributes {stable_mosaic.version = 11 : i64} {
  func.func @_conv1x1_bn_kernel(%arg0: i32, %arg1: memref<256x8xf32, #tpu.memory_space<vmem>>, %arg2: memref<8x16xf32, #tpu.memory_space<vmem>>, %arg3: memref<1x16xf32, #tpu.memory_space<vmem>>, %arg4: memref<256x16xf32, #tpu.memory_space<vmem>>) attributes {dimension_semantics = [#tpu.dimension_semantics<parallel>], iteration_bounds = array<i64: 2>, scalar_prefetch = 0 : i64, scratch_operands = 0 : i64, tpu.core_type = #tpu.core_type<tc>, window_params = [{transform_indices = @transform_0, window_bounds = array<i64: 256, 8>}, {pipeline_mode = #tpu.pipeline_mode<synchronous>, transform_indices = @transform_1, window_bounds = array<i64: 8, 16>}, {pipeline_mode = #tpu.pipeline_mode<synchronous>, transform_indices = @transform_2, window_bounds = array<i64: 1, 16>}, {transform_indices = @transform_3, window_bounds = array<i64: 256, 16>}]} {
    %c0 = arith.constant 0 : index
    %c0_0 = arith.constant 0 : index
    %0 = vector.load %arg1[%c0, %c0_0] : memref<256x8xf32, #tpu.memory_space<vmem>>, vector<256x8xf32>
    %c0_1 = arith.constant 0 : index
    %c0_2 = arith.constant 0 : index
    %1 = vector.load %arg2[%c0_1, %c0_2] : memref<8x16xf32, #tpu.memory_space<vmem>>, vector<8x16xf32>
    %cst = arith.constant dense<0.000000e+00> : vector<256x16xf32>
    %2 = tpu.matmul %0, %1, %cst {dimension_numbers = #tpu.dot_dimension_numbers<[1], [0], [0], [1], [0, 0, 1, 1], [], []>} : vector<256x8xf32>, vector<8x16xf32>, vector<256x16xf32> -> vector<256x16xf32>
    %c0_3 = arith.constant 0 : index
    %c0_4 = arith.constant 0 : index
    %3 = vector.load %arg3[%c0_3, %c0_4] : memref<1x16xf32, #tpu.memory_space<vmem>>, vector<1x16xf32>
    %4 = vector.broadcast %3 : vector<1x16xf32> to vector<256x16xf32>
    %5 = arith.addf %2, %4 : vector<256x16xf32>
    %c0_5 = arith.constant 0 : index
    %c0_6 = arith.constant 0 : index
    %6 = vector.load %arg4[%c0_5, %c0_6] : memref<256x16xf32, #tpu.memory_space<vmem>>, vector<256x16xf32>
    tpu.vector_store %arg4[%c0_5, %c0_6], %5 {strides = array<i32>} : memref<256x16xf32, #tpu.memory_space<vmem>>, vector<256x16xf32>,
    return
  }
  func.func @transform_0(%arg0: i32) -> (i32, i32) {
    %c0_i32 = arith.constant 0 : i32
    %c0_i32_0 = arith.constant 0 : i32
    return %arg0, %c0_i32 : i32, i32
  }
  func.func @transform_1(%arg0: i32) -> (i32, i32) {
    %c0_i32 = arith.constant 0 : i32
    %c0_i32_0 = arith.constant 0 : i32
    %c0_i32_1 = arith.constant 0 : i32
    return %c0_i32, %c0_i32_0 : i32, i32
  }
  func.func @transform_2(%arg0: i32) -> (i32, i32) {
    %c0_i32 = arith.constant 0 : i32
    %c0_i32_0 = arith.constant 0 : i32
    %c0_i32_1 = arith.constant 0 : i32
    return %c0_i32, %c0_i32_0 : i32, i32
  }
  func.func @transform_3(%arg0: i32) -> (i32, i32) {
    %c0_i32 = arith.constant 0 : i32
    %c0_i32_0 = arith.constant 0 : i32
    return %arg0, %c0_i32 : i32, i32
  }
}

</mosaic_0001>

<bundles_post_ra>
// kernel: tpu_custom_call.1
= control target key start
LH: loop header
LB: loop body
LE: loop exit
PB: predicated region body
PF: predicated region fallthrough
CT: control target
= control target key end

     0   :  { %s790_s12 = smov 0   ;;  %s986_s0 = inlined_call_operand.vmem [shape: f32[512,8], index: 0, kind: input, shape index: {}]   ;;  %s987_s1 = inlined_call_operand.vmem [shape: f32[8,16], index: 1, kind: input, shape index: {}]   ;;  %s988_s2 = inlined_call_operand.vmem [shape: f32[1,16], index: 2, kind: input, shape index: {}]   ;;  %s989_s3 = inlined_call_operand.vmem [shape: f32[512,16], index: 3, kind: output, shape index: {}]  }
   0x1 LB: > { %s625_s13 = sadd.s32 4294967295, %s768_s12   ;;  %p629_p0 = scmp.ge.s32.totalorder %s768_s12, 1  ;;  %s768_s12 = sphi %s790_s12, %s13_s12  }
   0x2   : > { %p138_p1 = scmp.lt.s32.totalorder %s768_s12, 3 }
   0x4   : > { %p139_p2 = pnand %p629_p0, %p138_p1 }
   0x5   : > { %v206_v0 = vld [vmem:[%s987_s1] sm:$0xff] (!%p139_p2)  ;;  %s630_s16 = sshll.u32 (!%p139_p2), %s625_s13, 5  ;;  %vm214_vm0 = vcmask (!%p139_p2), 64512   ;;  %vm536_vm1 = vcmask (!%p139_p2), 130048  }
   0x6   : > { %142 = sbr.rel (%p139_p2) target bundleno = 263 (0x107), region = 32  ;;  %702 = vmatprep.subr.mxu0 (!%p139_p2), %v206_v0  ;;  %752 = vmatprep.subr.mxu1 (!%p139_p2), %v206_v0  ;;  %p163_p3 = scmp.lt.s32.totalorder (!%p139_p2), %s630_s16, 63  ;;  %v878_v33 = vld [vmem:[%s988_s2] ss:$0 sm:$0xff] (!%p139_p2) }
   0x7   : > { %703 = vmatpush3.msra.mxu0 (!%p139_p2), %v206_v0  ;;  %753 = vmatpush3.msra.mxu1 (!%p139_p2), %v206_v0 }
   0xd   : > { %s991_s16 = smov (!%p163_p3, %s630_s16), 63 }
   0xe   : > { %s631_s17 = sshll.u32 %s991_s16, 3 }
   0xf   : > { %s809_s20 = scalar_lea.vmem %s986_s0, %s631_s17  ;;  %s885_s25 = scalar_lea.vmem %s989_s3, %s631_s17 }
  0x10   : > { %v174_v1 = vld [vmem:[%s809_s20] sm:$0xff]  ;;  %v175_v3 = vld [vmem:[%s809_s20 + $0x8] sm:$0xff]  ;;  %v176_v5 = vld [vmem:[%s809_s20 + $0x10] sm:$0xff] }
  0x11   : > { %v190_v2 = vld [vmem:[%s809_s20 + $0x80] sm:$0xff]  ;;  %704 = vmatprep.mubr.msk.f32.mxu0 %vm214_vm0, %v174_v1  ;;  %v191_v4 = vld [vmem:[%s809_s20 + $0x88] sm:$0xff]  ;;  %v192_v6 = vld [vmem:[%s809_s20 + $0x90] sm:$0xff] }
  0x12   : > { %728 = vmatprep.mubr.msk.f32.mxu1 %vm214_vm0, %v190_v2  ;;  %705 = vmatmul.mubr.msk.f32.vlgmr.msra.gmra.mrb[0].mxu0 %vm214_vm0, %v175_v3  ;;  %v177_v7 = vld [vmem:[%s809_s20 + $0x18] sm:$0xff]  ;;  %v178_v9 = vld [vmem:[%s809_s20 + $0x20] sm:$0xff]  ;;  %v179_v11 = vld [vmem:[%s809_s20 + $0x28] sm:$0xff] }
  0x13   : > { %729 = vmatmul.mubr.msk.f32.vlgmr.msra.gmra.mrb[0].mxu1 %vm214_vm0, %v191_v4  ;;  %707 = vmatprep.mubr.msk.f32.mxu0 %vm214_vm0, %v176_v5  ;;  %v193_v8 = vld [vmem:[%s809_s20 + $0x98] sm:$0xff]  ;;  %v194_v10 = vld [vmem:[%s809_s20 + $0xa0] sm:$0xff]  ;;  %v195_v12 = vld [vmem:[%s809_s20 + $0xa8] sm:$0xff] }
  0x14   : > { %731 = vmatprep.mubr.msk.f32.mxu1 %vm214_vm0, %v192_v6  ;;  %v180_v13 = vld [vmem:[%s809_s20 + $0x30] sm:$0xff]  ;;  %v181_v15 = vld [vmem:[%s809_s20 + $0x38] sm:$0xff]  ;;  %v182_v17 = vld [vmem:[%s809_s20 + $0x40] sm:$0xff] }
  0x15   : > { %v196_v14 = vld [vmem:[%s809_s20 + $0xb0] sm:$0xff]  ;;  %v197_v16 = vld [vmem:[%s809_s20 + $0xb8] sm:$0xff]  ;;  %v198_v18 = vld [vmem:[%s809_s20 + $0xc0] sm:$0xff] }
  0x16   : > { %708 = vmatmul.mubr.msk.f32.gmra.mrb[2].mxu0 %vm214_vm0, %v177_v7  ;;  %v183_v19 = vld [vmem:[%s809_s20 + $0x48] sm:$0xff]  ;;  %v184_v21 = vld [vmem:[%s809_s20 + $0x50] sm:$0xff]  ;;  %v185_v23 = vld [vmem:[%s809_s20 + $0x58] sm:$0xff] }
  0x17   : > { %732 = vmatmul.mubr.msk.f32.gmra.mrb[2].mxu1 %vm214_vm0, %v193_v8  ;;  %710 = vmatprep.mubr.msk.f32.mxu0 %vm214_vm0, %v178_v9  ;;  %v199_v20 = vld [vmem:[%s809_s20 + $0xc8] sm:$0xff]  ;;  %v200_v22 = vld [vmem:[%s809_s20 + $0xd0] sm:$0xff]  ;;  %v201_v24 = vld [vmem:[%s809_s20 + $0xd8] sm:$0xff] }
  0x18   : > { %734 = vmatprep.mubr.msk.f32.mxu1 %vm214_vm0, %v194_v10  ;;  %v186_v25 = vld [vmem:[%s809_s20 + $0x60] sm:$0xff]  ;;  %v187_v27 = vld [vmem:[%s809_s20 + $0x68] sm:$0xff]  ;;  %v188_v29 = vld [vmem:[%s809_s20 + $0x70] sm:$0xff] }
  0x19   : > { %v202_v26 = vld [vmem:[%s809_s20 + $0xe0] sm:$0xff]  ;;  %v203_v28 = vld [vmem:[%s809_s20 + $0xe8] sm:$0xff]  ;;  %v204_v30 = vld [vmem:[%s809_s20 + $0xf0] sm:$0xff] }
  0x1a   : > { %711 = vmatmul.mubr.msk.f32.gmra.mrb[4].mxu0 %vm214_vm0, %v179_v11  ;;  %v189_v31 = vld [vmem:[%s809_s20 + $0x78] sm:$0xff] }
  0x1b   : > { %735 = vmatmul.mubr.msk.f32.gmra.mrb[4].mxu1 %vm214_vm0, %v195_v12  ;;  %713 = vmatprep.mubr.msk.f32.mxu0 %vm214_vm0, %v180_v13  ;;  %v205_v32 = vld [vmem:[%s809_s20 + $0xf8] sm:$0xff] }
  0x1c   : > { %737 = vmatprep.mubr.msk.f32.mxu1 %vm214_vm0, %v196_v14 }
  0x1e   : > { %714 = vmatmul.mubr.msk.f32.gmra.mrb[6].mxu0 %vm214_vm0, %v181_v15 }
  0x1f   : > { %738 = vmatmul.mubr.msk.f32.gmra.mrb[6].mxu1 %vm214_vm0, %v197_v16  ;;  %716 = vmatprep.mubr.msk.f32.mxu0 %vm214_vm0, %v182_v17 }
  0x20   : > { %740 = vmatprep.mubr.msk.f32.mxu1 %vm214_vm0, %v198_v18 }
  0x22   : > { %717 = vmatmul.mubr.msk.f32.gmra.mrb[8].mxu0 %vm214_vm0, %v183_v19 }
  0x23   : > { %741 = vmatmul.mubr.msk.f32.gmra.mrb[8].mxu1 %vm214_vm0, %v199_v20  ;;  %719 = vmatprep.mubr.msk.f32.mxu0 %vm214_vm0, %v184_v21 }
  0x24   : > { %743 = vmatprep.mubr.msk.f32.mxu1 %vm214_vm0, %v200_v22 }
  0x26   : > { %720 = vmatmul.mubr.msk.f32.gmra.mrb[10].mxu0 %vm214_vm0, %v185_v23 }
  0x27   : > { %744 = vmatmul.mubr.msk.f32.gmra.mrb[10].mxu1 %vm214_vm0, %v201_v24  ;;  %722 = vmatprep.mubr.msk.f32.mxu0 %vm214_vm0, %v186_v25 }
  0x28   : > { %746 = vmatprep.mubr.msk.f32.mxu1 %vm214_vm0, %v202_v26 }
  0x2a   : > { %723 = vmatmul.mubr.msk.f32.gmra.mrb[12].mxu0 %vm214_vm0, %v187_v27 }
  0x2b   : > { %747 = vmatmul.mubr.msk.f32.gmra.mrb[12].mxu1 %vm214_vm0, %v203_v28  ;;  %725 = vmatprep.mubr.msk.f32.mxu0 %vm214_vm0, %v188_v29 }
  0x2c   : > { %749 = vmatprep.mubr.msk.f32.mxu1 %vm214_vm0, %v204_v30 }
  0x2e   : > { %726 = vmatmul.mubr.msk.f32.gmra.mrb[14].mxu0 %vm214_vm0, %v189_v31 }
  0x2f   : > { %750 = vmatmul.mubr.msk.f32.gmra.mrb[14].mxu1 %vm214_vm0, %v205_v32 }
  0xe5   : > { %v706_v34 = vpop.f32.mrb[0].mxu0 }
  0xe6   : > { %v730_v35 = vpop.f32.mrb[0].mxu1  ;;  %v383_v36 = vadd.f32 %v706_v34, %v878_v33  ;;  %v377_v38 = vpop.f32.mrb[1].mxu0 }
  0xe7   : > { %v463_v37 = vadd.f32 %v730_v35, %v878_v33  ;;  %v457_v39 = vpop.f32.mrb[1].mxu1  ;;  %v378_v40 = vadd.f32 %v878_v33, %v377_v38 }
  0xe8   : > { %v458_v41 = vadd.f32 %v878_v33, %v457_v39  ;;  %538 = vst.msk [vmem:[%s885_s25 + $0x8] sm:$0xff] %vm536_vm1, %v383_v36 }
  0xe9   : > { %554 = vst.msk [vmem:[%s885_s25 + $0x88] sm:$0xff] %vm536_vm1, %v463_v37  ;;  %537 = vst.msk [vmem:[%s885_s25] sm:$0xff] %vm536_vm1, %v378_v40  ;;  %v709_v42 = vpop.f32.mrb[2].mxu0 }
  0xea   : > { %553 = vst.msk [vmem:[%s885_s25 + $0x80] sm:$0xff] %vm536_vm1, %v458_v41  ;;  %v733_v43 = vpop.f32.mrb[2].mxu1  ;;  %v393_v44 = vadd.f32 %v709_v42, %v878_v33  ;;  %v387_v46 = vpop.f32.mrb[3].mxu0 }
  0xeb   : > { %v473_v45 = vadd.f32 %v733_v43, %v878_v33  ;;  %v467_v47 = vpop.f32.mrb[3].mxu1  ;;  %v388_v48 = vadd.f32 %v878_v33, %v387_v46 }
  0xec   : > { %v468_v49 = vadd.f32 %v878_v33, %v467_v47  ;;  %540 = vst.msk [vmem:[%s885_s25 + $0x18] sm:$0xff] %vm536_vm1, %v393_v44 }
  0xed   : > { %556 = vst.msk [vmem:[%s885_s25 + $0x98] sm:$0xff] %vm536_vm1, %v473_v45  ;;  %539 = vst.msk [vmem:[%s885_s25 + $0x10] sm:$0xff] %vm536_vm1, %v388_v48  ;;  %v712_v50 = vpop.f32.mrb[4].mxu0 }
  0xee   : > { %555 = vst.msk [vmem:[%s885_s25 + $0x90] sm:$0xff] %vm536_vm1, %v468_v49  ;;  %v736_v51 = vpop.f32.mrb[4].mxu1  ;;  %v403_v52 = vadd.f32 %v712_v50, %v878_v33  ;;  %v397_v54 = vpop.f32.mrb[5].mxu0 }
  0xef   : > { %v483_v53 = vadd.f32 %v736_v51, %v878_v33  ;;  %v477_v55 = vpop.f32.mrb[5].mxu1  ;;  %v398_v56 = vadd.f32 %v878_v33, %v397_v54 }
  0xf0   : > { %v478_v57 = vadd.f32 %v878_v33, %v477_v55  ;;  %542 = vst.msk [vmem:[%s885_s25 + $0x28] sm:$0xff] %vm536_vm1, %v403_v52 }
  0xf1   : > { %558 = vst.msk [vmem:[%s885_s25 + $0xa8] sm:$0xff] %vm536_vm1, %v483_v53  ;;  %541 = vst.msk [vmem:[%s885_s25 + $0x20] sm:$0xff] %vm536_vm1, %v398_v56  ;;  %v715_v58 = vpop.f32.mrb[6].mxu0 }
  0xf2   : > { %557 = vst.msk [vmem:[%s885_s25 + $0xa0] sm:$0xff] %vm536_vm1, %v478_v57  ;;  %v739_v59 = vpop.f32.mrb[6].mxu1  ;;  %v413_v60 = vadd.f32 %v715_v58, %v878_v33  ;;  %v407_v62 = vpop.f32.mrb[7].mxu0 }
  0xf3   : > { %v493_v61 = vadd.f32 %v739_v59, %v878_v33  ;;  %v487_v63 = vpop.f32.mrb[7].mxu1  ;;  %v408_v0 = vadd.f32 %v878_v33, %v407_v62 }
  0xf4   : > { %v488_v1 = vadd.f32 %v878_v33, %v487_v63  ;;  %544 = vst.msk [vmem:[%s885_s25 + $0x38] sm:$0xff] %vm536_vm1, %v413_v60 }
  0xf5   : > { %560 = vst.msk [vmem:[%s885_s25 + $0xb8] sm:$0xff] %vm536_vm1, %v493_v61  ;;  %543 = vst.msk [vmem:[%s885_s25 + $0x30] sm:$0xff] %vm536_vm1, %v408_v0  ;;  %v718_v2 = vpop.f32.mrb[8].mxu0 }
  0xf6   : > { %559 = vst.msk [vmem:[%s885_s25 + $0xb0] sm:$0xff] %vm536_vm1, %v488_v1  ;;  %v742_v3 = vpop.f32.mrb[8].mxu1  ;;  %v423_v4 = vadd.f32 %v718_v2, %v878_v33  ;;  %v417_v6 = vpop.f32.mrb[9].mxu0 }
  0xf7   : > { %v503_v5 = vadd.f32 %v742_v3, %v878_v33  ;;  %v497_v7 = vpop.f32.mrb[9].mxu1  ;;  %v418_v8 = vadd.f32 %v878_v33, %v417_v6 }
  0xf8   : > { %v498_v9 = vadd.f32 %v878_v33, %v497_v7  ;;  %546 = vst.msk [vmem:[%s885_s25 + $0x48] sm:$0xff] %vm536_vm1, %v423_v4 }
  0xf9   : > { %562 = vst.msk [vmem:[%s885_s25 + $0xc8] sm:$0xff] %vm536_vm1, %v503_v5  ;;  %545 = vst.msk [vmem:[%s885_s25 + $0x40] sm:$0xff] %vm536_vm1, %v418_v8  ;;  %v721_v10 = vpop.f32.mrb[10].mxu0 }
  0xfa   : > { %561 = vst.msk [vmem:[%s885_s25 + $0xc0] sm:$0xff] %vm536_vm1, %v498_v9  ;;  %v745_v11 = vpop.f32.mrb[10].mxu1  ;;  %v433_v12 = vadd.f32 %v721_v10, %v878_v33  ;;  %v427_v14 = vpop.f32.mrb[11].mxu0 }
  0xfb   : > { %v513_v13 = vadd.f32 %v745_v11, %v878_v33  ;;  %v507_v15 = vpop.f32.mrb[11].mxu1  ;;  %v428_v16 = vadd.f32 %v878_v33, %v427_v14 }
  0xfc   : > { %v508_v17 = vadd.f32 %v878_v33, %v507_v15  ;;  %548 = vst.msk [vmem:[%s885_s25 + $0x58] sm:$0xff] %vm536_vm1, %v433_v12 }
  0xfd   : > { %564 = vst.msk [vmem:[%s885_s25 + $0xd8] sm:$0xff] %vm536_vm1, %v513_v13  ;;  %547 = vst.msk [vmem:[%s885_s25 + $0x50] sm:$0xff] %vm536_vm1, %v428_v16  ;;  %v724_v18 = vpop.f32.mrb[12].mxu0 }
  0xfe   : > { %563 = vst.msk [vmem:[%s885_s25 + $0xd0] sm:$0xff] %vm536_vm1, %v508_v17  ;;  %v748_v19 = vpop.f32.mrb[12].mxu1  ;;  %v443_v20 = vadd.f32 %v724_v18, %v878_v33  ;;  %v437_v22 = vpop.f32.mrb[13].mxu0 }
  0xff   : > { %v523_v21 = vadd.f32 %v748_v19, %v878_v33  ;;  %v517_v23 = vpop.f32.mrb[13].mxu1  ;;  %v438_v24 = vadd.f32 %v878_v33, %v437_v22 }
 0x100   : > { %v518_v25 = vadd.f32 %v878_v33, %v517_v23  ;;  %550 = vst.msk [vmem:[%s885_s25 + $0x68] sm:$0xff] %vm536_vm1, %v443_v20 }
 0x101   : > { %566 = vst.msk [vmem:[%s885_s25 + $0xe8] sm:$0xff] %vm536_vm1, %v523_v21  ;;  %549 = vst.msk [vmem:[%s885_s25 + $0x60] sm:$0xff] %vm536_vm1, %v438_v24  ;;  %v727_v26 = vpop.f32.mrb[14].mxu0 }
 0x102   : > { %565 = vst.msk [vmem:[%s885_s25 + $0xe0] sm:$0xff] %vm536_vm1, %v518_v25  ;;  %v751_v27 = vpop.f32.mrb[14].mxu1  ;;  %v453_v28 = vadd.f32 %v727_v26, %v878_v33  ;;  %v447_v30 = vpop.f32.mrb[15].mxu0 }
 0x103   : > { %v533_v29 = vadd.f32 %v751_v27, %v878_v33  ;;  %v527_v31 = vpop.f32.mrb[15].mxu1  ;;  %v448_v32 = vadd.f32 %v878_v33, %v447_v30 }
 0x104   : > { %v528_v34 = vadd.f32 %v878_v33, %v527_v31  ;;  %552 = vst.msk [vmem:[%s885_s25 + $0x78] sm:$0xff] %vm536_vm1, %v453_v28 }
 0x105   : > { %568 = vst.msk [vmem:[%s885_s25 + $0xf8] sm:$0xff] %vm536_vm1, %v533_v29  ;;  %551 = vst.msk [vmem:[%s885_s25 + $0x70] sm:$0xff] %vm536_vm1, %v448_v32 }
 0x106   : > { %567 = vst.msk [vmem:[%s885_s25 + $0xf0] sm:$0xff] %vm536_vm1, %v528_v34 }
 0x107 PF: > { %s13_s12 = sadd.s32 1, %s768_s12  }
 0x108   : > { %p10_p4 = scmp.ge.s32.totalorder %s13_s12, 4  }
 0x10a   :  { %12 = sbr.rel (!%p10_p4) target bundleno = 1 (0x1), region = 62 }

</bundles_post_ra>
